<compile_context>
chip_gen: v6e
topology: v6e:2x2x1
jax: 0.10.0
libtpu: 0.0.40
codegen_flags: <defaults>
</compile_context>

<pallas_src>
import functools

import jax
import jax.numpy as jnp
from jax import lax
from jax.experimental import pallas as pl
from jax.experimental.pallas import tpu as pltpu

LANE = 128


# ---------------------------------------------------------------------------
# Fused Pallas kernel: both GCN layers + both views + standardize epilogue
# ---------------------------------------------------------------------------
def _fused_cca_kernel(a_ref, x_ref, w0_ref, b0_ref, w1_ref, b1_ref, z_ref, *, n):
    """z = standardize_per_view( A @ (relu(A @ (X @ W0) + b0) @ W1) + b1 ).

    a_ref : (2N, 2N) block-diagonal normalized adjacency [A1 0; 0 A2]
    x_ref : (2N, IN_PAD)  row-stacked [x1; x2], zero-padded to 128 lanes
    w*/b* : zero-padded weights / biases (padding keeps the math exact)
    z_ref : (2N, OUT_PAD) standardized output (padded cols sliced off outside)
    """
    f32 = jnp.float32

    # ---- layer 0: one matmul pair covers both stacked views ------------------
    xw0 = jnp.dot(x_ref[...], w0_ref[...], preferred_element_type=f32)
    h = jnp.dot(a_ref[...], xw0, preferred_element_type=f32) + b0_ref[...]
    h = jnp.maximum(h, 0.0)

    # ---- layer 1 --------------------------------------------------------------
    xw1 = jnp.dot(h, w1_ref[...], preferred_element_type=f32)
    h = jnp.dot(a_ref[...], xw1, preferred_element_type=f32) + b1_ref[...]

    # ---- per-view column standardization (matches torch .std(0): ddof=1, no eps)
    def _standardize(block):
        mean = jnp.mean(block, axis=0, keepdims=True)
        c = block - mean
        var = jnp.sum(c * c, axis=0, keepdims=True) * (1.0 / (n - 1.0))
        # rsqrt lands on the EUP slot (free relative to VALU); multiply on VPU.
        # Zero-padded (all-zero) columns produce NaN here, which the wrapper
        # slices off; genuinely constant real columns give inf/nan exactly
        # like torch's (h - mean) / std.
        return c * lax.rsqrt(var)

    z1 = _standardize(h[:n, :])      # view 1: rows 0..N-1
    z2 = _standardize(h[n:, :])      # view 2: rows N..2N-1
    # single lane-dense, unmasked full-tile store
    z_ref[...] = jnp.concatenate([z1, z2], axis=0).astype(z_ref.dtype)


def _fused_forward(a_big, x_big, w0, b0, w1, b1, n):
    two_n = a_big.shape[0]
    out_pad = w1.shape[1]
    kernel = functools.partial(_fused_cca_kernel, n=n)
    vmem = pl.BlockSpec(memory_space=pltpu.MemorySpace.VMEM)
    return pl.pallas_call(
        kernel,
        out_shape=jax.ShapeDtypeStruct((two_n, out_pad), jnp.float32),
        in_specs=[vmem] * 6,
        out_specs=vmem,
    )(a_big, x_big, w0, b0, w1, b1)


# ---------------------------------------------------------------------------
# Plain-JAX glue: normalized adjacency, padding, parameter init
# ---------------------------------------------------------------------------
def normalized_adjacency(edge_index, num_nodes):
    """Dense D^{-1/2} (A + I) D^{-1/2} from edge_index of shape (2, E).

    NOTE: degree is taken as a column sum; this matches PyG's symmetric GCN
    normalization because the edge list is symmetrized (undirected graph).
    """
    # TODO(synk): for real-sized graphs keep the graph sparse and gather
    # neighbor rows via PrefetchScalarGridSpec instead of materializing the
    # dense (N, N) A_hat; tile A_hat against per-chip VMEM (64 MiB on v7x)
    # and cast matmul operands to bf16 for the 256x256 MXUs.
    src, dst = edge_index[0], edge_index[1]
    a = jnp.zeros((num_nodes, num_nodes), jnp.float32)
    a = a.at[src, dst].add(1.0)
    a = a + jnp.eye(num_nodes, dtype=jnp.float32)  # add self loops
    deg = jnp.sum(a, axis=0)
    d_inv_sqrt = jnp.where(deg > 0, lax.rsqrt(deg), 0.0)
    return d_inv_sqrt[:, None] * a * d_inv_sqrt[None, :]


def _round_up(v, m):
    return ((v + m - 1) // m) * m


def _pad2d(a, rows, cols):
    return jnp.pad(a, ((0, rows - a.shape[0]), (0, cols - a.shape[1])))


def init_gcn_params(in_dim, hid_dim, out_dim, key):
    """Deterministically initialized 2-layer GCN weights (Glorot uniform)."""
    k0, k1 = jax.random.split(key)

    def glorot(k, fan_in, fan_out):
        lim = jnp.sqrt(6.0 / (fan_in + fan_out))
        return jax.random.uniform(k, (fan_in, fan_out), jnp.float32, -lim, lim)

    return {
        "w0": glorot(k0, in_dim, hid_dim),
        "b0": jnp.zeros((hid_dim,), jnp.float32),
        "w1": glorot(k1, hid_dim, out_dim),
        "b1": jnp.zeros((out_dim,), jnp.float32),
    }


def cca_ssg_forward(params, x1, edge_index1, x2, edge_index2):
    """CCA_SSG.forward with a 2-layer GCN backbone, fused into one kernel call.

    (The fused kernel is specialized to the module's default n_layers=2.)
    """
    n, in_dim = x1.shape
    hid_dim = params["w0"].shape[1]
    out_dim = params["w1"].shape[1]

    a1 = normalized_adjacency(edge_index1, n)
    a2 = normalized_adjacency(edge_index2, n)

    # Block-diagonal A_hat so one (2N,2N) @ (2N,F) matmul propagates both views.
    a_big = jnp.zeros((2 * n, 2 * n), jnp.float32)
    a_big = a_big.at[:n, :n].set(a1).at[n:, n:].set(a2)

    # Zero-pad all feature dims to 128 lanes (exact math: padded X cols are 0,
    # padded W rows/cols are 0, padded biases are 0).
    in_pad = _round_up(in_dim, LANE)
    hid_pad = _round_up(hid_dim, LANE)
    out_pad = _round_up(out_dim, LANE)

    x_big = _pad2d(jnp.concatenate([x1, x2], axis=0).astype(jnp.float32),
                   2 * n, in_pad)
    w0 = _pad2d(params["w0"], in_pad, hid_pad)
    w1 = _pad2d(params["w1"], hid_pad, out_pad)
    b0 = _pad2d(params["b0"].reshape(1, -1), 1, hid_pad)
    b1 = _pad2d(params["b1"].reshape(1, -1), 1, out_pad)

    z_pad = _fused_forward(a_big, x_big, w0, b0, w1, b1, n)
    z1 = z_pad[:n, :out_dim]
    z2 = z_pad[n:, :out_dim]
    return z1, z2


# ---------------------------------------------------------------------------
# Pure-JAX reference (for an in-script sanity check)
# ---------------------------------------------------------------------------
def _reference_forward(params, x1, ei1, x2, ei2):
    n = x1.shape[0]
    a1 = normalized_adjacency(ei1, n)
    a2 = normalized_adjacency(ei2, n)

    def gcn(x, a):
        h = a @ (x @ params["w0"]) + params["b0"]
        h = jnp.maximum(h, 0.0)
        return a @ (h @ params["w1"]) + params["b1"]

    def std(h):
        m = h.mean(0, keepdims=True)
        c = h - m
        v = (c * c).sum(0, keepdims=True) / (h.shape[0] - 1)
        return c / jnp.sqrt(v)

    return std(gcn(x1, a1)), std(gcn(x2, a2))


# ---------------------------------------------------------------------------
# Main
# ---------------------------------------------------------------------------
if __name__ == "__main__":
    key = jax.random.PRNGKey(0)

    N = 16        # number of graph nodes
    IN_DIM = 8
    HID_DIM = 32
    OUT_DIM = 16
    E = 24        # directed edges before symmetrization

    k_x1, k_x2, k_src, k_dst, k_params = jax.random.split(key, 5)

    x1 = jax.random.normal(k_x1, (N, IN_DIM), jnp.float32)
    x2 = jax.random.normal(k_x2, (N, IN_DIM), jnp.float32)

    src = jax.random.randint(k_src, (E,), 0, N)
    dst = jax.random.randint(k_dst, (E,), 0, N)
    # symmetrize the edge list (undirected graph, as typical for CCA-SSG data)
    edge_index = jnp.stack(
        [jnp.concatenate([src, dst]), jnp.concatenate([dst, src])], axis=0
    )

    params = init_gcn_params(IN_DIM, HID_DIM, OUT_DIM, k_params)

    fwd = jax.jit(cca_ssg_forward)
    z1, z2 = fwd(params, x1, edge_index, x2, edge_index)
    jax.block_until_ready((z1, z2))

    assert z1.shape == (N, OUT_DIM) and z2.shape == (N, OUT_DIM)
    assert bool(jnp.all(jnp.isfinite(z1))) and bool(jnp.all(jnp.isfinite(z2)))

    # sanity check against the pure-JAX reference (loose tol: MXU vs XLA matmul paths)
    r1, r2 = _reference_forward(params, x1, edge_index, x2, edge_index)
    assert bool(jnp.allclose(z1, r1, rtol=5e-2, atol=5e-2))
    assert bool(jnp.allclose(z2, r2, rtol=5e-2, atol=5e-2))

    print("KERNEL_OK")
</pallas_src>

<mosaic_0001>
module attributes {stable_mosaic.version = 11 : i64} {
  func.func private @main(%arg0: i32) attributes {dimension_semantics = [#tpu.dimension_semantics<core_parallel>], iteration_bounds = array<i64: 2>, tpu.core_type = #tpu.core_type<sc_scalar_subcore>, window_params = []} {
    return
  }
}

module attributes {stable_mosaic.version = 11 : i64} {
  func.func private @main(%arg0: i32) attributes {dimension_semantics = [#tpu.dimension_semantics<core_parallel>], iteration_bounds = array<i64: 2>, tpu.core_type = #tpu.core_type<sc_scalar_subcore>, window_params = []} {
    return
  }
}

module attributes {stable_mosaic.version = 11 : i64} {
  func.func @_fused_cca_kernel(%arg0: memref<32x32xf32, #tpu.memory_space<vmem>>, %arg1: memref<32x128xf32, #tpu.memory_space<vmem>>, %arg2: memref<128x128xf32, #tpu.memory_space<vmem>>, %arg3: memref<1x128xf32, #tpu.memory_space<vmem>>, %arg4: memref<128x128xf32, #tpu.memory_space<vmem>>, %arg5: memref<1x128xf32, #tpu.memory_space<vmem>>, %arg6: memref<32x128xf32, #tpu.memory_space<vmem>>) attributes {dimension_semantics = [], scalar_prefetch = 0 : i64, scratch_operands = 0 : i64, tpu.core_type = #tpu.core_type<tc>} {
    %c0 = arith.constant 0 : index
    %c0_0 = arith.constant 0 : index
    %0 = vector.load %arg1[%c0, %c0_0] : memref<32x128xf32, #tpu.memory_space<vmem>>, vector<32x128xf32>
    %c0_1 = arith.constant 0 : index
    %c0_2 = arith.constant 0 : index
    %1 = vector.load %arg2[%c0_1, %c0_2] : memref<128x128xf32, #tpu.memory_space<vmem>>, vector<128x128xf32>
    %cst = arith.constant dense<0.000000e+00> : vector<32x128xf32>
    %2 = tpu.matmul %0, %1, %cst {dimension_numbers = #tpu.dot_dimension_numbers<[1], [0], [0], [1], [0, 0, 1, 1], [], []>} : vector<32x128xf32>, vector<128x128xf32>, vector<32x128xf32> -> vector<32x128xf32>
    %c0_3 = arith.constant 0 : index
    %c0_4 = arith.constant 0 : index
    %3 = vector.load %arg0[%c0_3, %c0_4] : memref<32x32xf32, #tpu.memory_space<vmem>>, vector<32x32xf32>
    %cst_5 = arith.constant dense<0.000000e+00> : vector<32x128xf32>
    %4 = tpu.matmul %3, %2, %cst_5 {dimension_numbers = #tpu.dot_dimension_numbers<[1], [0], [0], [1], [0, 0, 1, 1], [], []>} : vector<32x32xf32>, vector<32x128xf32>, vector<32x128xf32> -> vector<32x128xf32>
    %c0_6 = arith.constant 0 : index
    %c0_7 = arith.constant 0 : index
    %5 = vector.load %arg3[%c0_6, %c0_7] : memref<1x128xf32, #tpu.memory_space<vmem>>, vector<1x128xf32>
    %6 = vector.broadcast %5 : vector<1x128xf32> to vector<32x128xf32>
    %7 = arith.addf %4, %6 : vector<32x128xf32>
    %cst_8 = arith.constant 0.000000e+00 : f32
    %8 = vector.broadcast %cst_8 : f32 to vector<32x128xf32>
    %9 = arith.maximumf %7, %8 : vector<32x128xf32>
    %c0_9 = arith.constant 0 : index
    %c0_10 = arith.constant 0 : index
    %10 = vector.load %arg4[%c0_9, %c0_10] : memref<128x128xf32, #tpu.memory_space<vmem>>, vector<128x128xf32>
    %cst_11 = arith.constant dense<0.000000e+00> : vector<32x128xf32>
    %11 = tpu.matmul %9, %10, %cst_11 {dimension_numbers = #tpu.dot_dimension_numbers<[1], [0], [0], [1], [0, 0, 1, 1], [], []>} : vector<32x128xf32>, vector<128x128xf32>, vector<32x128xf32> -> vector<32x128xf32>
    %c0_12 = arith.constant 0 : index
    %c0_13 = arith.constant 0 : index
    %12 = vector.load %arg0[%c0_12, %c0_13] : memref<32x32xf32, #tpu.memory_space<vmem>>, vector<32x32xf32>
    %cst_14 = arith.constant dense<0.000000e+00> : vector<32x128xf32>
    %13 = tpu.matmul %12, %11, %cst_14 {dimension_numbers = #tpu.dot_dimension_numbers<[1], [0], [0], [1], [0, 0, 1, 1], [], []>} : vector<32x32xf32>, vector<32x128xf32>, vector<32x128xf32> -> vector<32x128xf32>
    %c0_15 = arith.constant 0 : index
    %c0_16 = arith.constant 0 : index
    %14 = vector.load %arg5[%c0_15, %c0_16] : memref<1x128xf32, #tpu.memory_space<vmem>>, vector<1x128xf32>
    %15 = vector.broadcast %14 : vector<1x128xf32> to vector<32x128xf32>
    %16 = arith.addf %13, %15 : vector<32x128xf32>
    %17 = vector.extract_strided_slice %16 {offsets = [0, 0], sizes = [16, 128], strides = [1, 1]} : vector<32x128xf32> to vector<16x128xf32>
    %cst_17 = arith.constant dense<0.000000e+00> : vector<128xf32>
    %18 = vector.multi_reduction <add>, %17, %cst_17 [0] : vector<16x128xf32> to vector<128xf32>
    %19 = vector.shape_cast %18 : vector<128xf32> to vector<1x128xf32>
    %cst_18 = arith.constant 1.600000e+01 : f32
    %20 = vector.broadcast %cst_18 : f32 to vector<1x128xf32>
    %21 = arith.divf %19, %20 : vector<1x128xf32>
    %22 = vector.broadcast %21 : vector<1x128xf32> to vector<16x128xf32>
    %23 = arith.subf %17, %22 : vector<16x128xf32>
    %24 = arith.mulf %23, %23 : vector<16x128xf32>
    %cst_19 = arith.constant dense<0.000000e+00> : vector<128xf32>
    %25 = vector.multi_reduction <add>, %24, %cst_19 [0] : vector<16x128xf32> to vector<128xf32>
    %26 = vector.shape_cast %25 : vector<128xf32> to vector<1x128xf32>
    %cst_20 = arith.constant 0.0666666701 : f32
    %27 = vector.broadcast %cst_20 : f32 to vector<1x128xf32>
    %28 = arith.mulf %26, %27 : vector<1x128xf32>
    %29 = math.rsqrt %28 : vector<1x128xf32>
    %30 = vector.broadcast %29 : vector<1x128xf32> to vector<16x128xf32>
    %31 = arith.mulf %23, %30 : vector<16x128xf32>
    %32 = vector.extract_strided_slice %16 {offsets = [16, 0], sizes = [16, 128], strides = [1, 1]} : vector<32x128xf32> to vector<16x128xf32>
    %cst_21 = arith.constant dense<0.000000e+00> : vector<128xf32>
    %33 = vector.multi_reduction <add>, %32, %cst_21 [0] : vector<16x128xf32> to vector<128xf32>
    %34 = vector.shape_cast %33 : vector<128xf32> to vector<1x128xf32>
    %cst_22 = arith.constant 1.600000e+01 : f32
    %35 = vector.broadcast %cst_22 : f32 to vector<1x128xf32>
    %36 = arith.divf %34, %35 : vector<1x128xf32>
    %37 = vector.broadcast %36 : vector<1x128xf32> to vector<16x128xf32>
    %38 = arith.subf %32, %37 : vector<16x128xf32>
    %39 = arith.mulf %38, %38 : vector<16x128xf32>
    %cst_23 = arith.constant dense<0.000000e+00> : vector<128xf32>
    %40 = vector.multi_reduction <add>, %39, %cst_23 [0] : vector<16x128xf32> to vector<128xf32>
    %41 = vector.shape_cast %40 : vector<128xf32> to vector<1x128xf32>
    %cst_24 = arith.constant 0.0666666701 : f32
    %42 = vector.broadcast %cst_24 : f32 to vector<1x128xf32>
    %43 = arith.mulf %41, %42 : vector<1x128xf32>
    %44 = math.rsqrt %43 : vector<1x128xf32>
    %45 = vector.broadcast %44 : vector<1x128xf32> to vector<16x128xf32>
    %46 = arith.mulf %38, %45 : vector<16x128xf32>
    %47 = tpu.concatenate %31, %46 in 0 : vector<16x128xf32>, vector<16x128xf32> -> vector<32x128xf32>
    %c0_25 = arith.constant 0 : index
    %c0_26 = arith.constant 0 : index
    %48 = vector.load %arg6[%c0_25, %c0_26] : memref<32x128xf32, #tpu.memory_space<vmem>>, vector<32x128xf32>
    tpu.vector_store %arg6[%c0_25, %c0_26], %47 {strides = array<i32>} : memref<32x128xf32, #tpu.memory_space<vmem>>, vector<32x128xf32>,
    return
  }
}

</mosaic_0001>

<bundles_post_ra>
// kernel: cca_ssg_forward.1
= control target key start
LH: loop header
LB: loop body
LE: loop exit
PB: predicated region body
PF: predicated region fallthrough
CT: control target
= control target key end

     0   :  { %vm139_vm0 = vcmask 261120   ;;  %s856_s2 = inlined_call_operand.vmem [shape: f32[128,128], index: 2, kind: input, shape index: {}]   ;;  %s857_s1 = inlined_call_operand.vmem [shape: f32[32,128], index: 1, kind: input, shape index: {}]   ;;  %s858_s0 = inlined_call_operand.vmem [shape: f32[32,32], index: 0, kind: input, shape index: {}]   ;;  %s859_s4 = inlined_call_operand.vmem [shape: f32[128,128], index: 4, kind: input, shape index: {}]   ;;  %s860_s3 = inlined_call_operand.vmem [shape: f32[1,128], index: 3, kind: input, shape index: {}]   ;;  %s861_s5 = inlined_call_operand.vmem [shape: f32[1,128], index: 5, kind: input, shape index: {}]   ;;  %s862_s6 = inlined_call_operand.vmem [shape: f32[32,128], index: 6, kind: output, shape index: {}]  }
   0x1   :  { %v42_v0 = vld [vmem:[%s856_s2 + $0x78] sm:$0xff]  ;;  %v41_v1 = vld [vmem:[%s856_s2 + $0x70] sm:$0xff]  ;;  %v40_v2 = vld [vmem:[%s856_s2 + $0x68] sm:$0xff] }
   0x2   :  { %555 = vmatprep.subr.mxu0 %v42_v0  ;;  %v39_v3 = vld [vmem:[%s856_s2 + $0x60] sm:$0xff]  ;;  %v38_v5 = vld [vmem:[%s856_s2 + $0x58] sm:$0xff]  ;;  %v37_v6 = vld [vmem:[%s856_s2 + $0x50] sm:$0xff] }
   0x3   :  { %556 = vmatpush3.msra.mxu0 %v42_v0  ;;  %v23_v4 = vld [vmem:[%s857_s1] sm:$0xff]  ;;  %v36_v7 = vld [vmem:[%s856_s2 + $0x48] sm:$0xff]  ;;  %v34_v9 = vld [vmem:[%s856_s2 + $0x38] sm:$0xff] }
   0x4   :  { %557 = vmatprep.subr.mxu0 %v41_v1  ;;  %587 = vmatprep.mubr.f32.mxu0 %v23_v4  ;;  %v35_v8 = vld [vmem:[%s856_s2 + $0x40] sm:$0xff]  ;;  %v33_v10 = vld [vmem:[%s856_s2 + $0x30] sm:$0xff]  ;;  %v32_v11 = vld [vmem:[%s856_s2 + $0x28] sm:$0xff] }
   0x5   :  { %558 = vmatpush3.msra.mxu0 %v41_v1  ;;  %v31_v12 = vld [vmem:[%s856_s2 + $0x20] sm:$0xff]  ;;  %v30_v13 = vld [vmem:[%s856_s2 + $0x18] sm:$0xff]  ;;  %v29_v14 = vld [vmem:[%s856_s2 + $0x10] sm:$0xff] }
   0x6   :  { %559 = vmatprep.subr.mxu0 %v40_v2  ;;  %v28_v15 = vld [vmem:[%s856_s2 + $0x8] sm:$0xff]  ;;  %v27_v16 = vld [vmem:[%s856_s2] sm:$0xff]  ;;  %v25_v18 = vld [vmem:[%s857_s1 + $0x10] sm:$0xff] }
   0x7   :  { %560 = vmatpush3.msra.mxu0 %v40_v2  ;;  %v24_v17 = vld [vmem:[%s857_s1 + $0x8] sm:$0xff]  ;;  %v26_v19 = vld [vmem:[%s857_s1 + $0x18] sm:$0xff]  ;;  %v128_v20 = vld [vmem:[%s858_s0] sm:$0xff] }
   0x8   :  { %561 = vmatprep.subr.mxu0 %v39_v3  ;;  %601 = vmatprep.mubr.msk.f32.mxu1 %vm139_vm0, %v128_v20  ;;  %v766_v25 = vld [vmem:[%s858_s0 + $0x8] sm:$0xff]  ;;  %v256_v26 = vld [vmem:[%s859_s4 + $0x78] sm:$0xff]  ;;  %v774_v27 = vld [vmem:[%s858_s0 + $0x10] sm:$0xff] }
   0x9   :  { %562 = vmatpush3.msra.mxu0 %v39_v3  ;;  %v255_v28 = vld [vmem:[%s859_s4 + $0x70] sm:$0xff]  ;;  %v786_v29 = vld [vmem:[%s858_s0 + $0x18] sm:$0xff]  ;;  %v254_v30 = vld [vmem:[%s859_s4 + $0x68] sm:$0xff] }
   0xa   :  { %563 = vmatprep.subr.mxu0 %v38_v5  ;;  %v253_v31 = vld [vmem:[%s859_s4 + $0x60] sm:$0xff]  ;;  %v252_v32 = vld [vmem:[%s859_s4 + $0x58] sm:$0xff]  ;;  %v251_v33 = vld [vmem:[%s859_s4 + $0x50] sm:$0xff] }
   0xb   :  { %564 = vmatpush3.msra.mxu0 %v38_v5  ;;  %v250_v34 = vld [vmem:[%s859_s4 + $0x48] sm:$0xff]  ;;  %v249_v35 = vld [vmem:[%s859_s4 + $0x40] sm:$0xff]  ;;  %v248_v36 = vld [vmem:[%s859_s4 + $0x38] sm:$0xff] }
   0xc   :  { %565 = vmatprep.subr.mxu0 %v37_v6  ;;  %v247_v37 = vld [vmem:[%s859_s4 + $0x30] sm:$0xff]  ;;  %v246_v38 = vld [vmem:[%s859_s4 + $0x28] sm:$0xff]  ;;  %v245_v39 = vld [vmem:[%s859_s4 + $0x20] sm:$0xff] }
   0xd   :  { %566 = vmatpush3.msra.mxu0 %v37_v6  ;;  %v244_v40 = vld [vmem:[%s859_s4 + $0x18] sm:$0xff]  ;;  %v243_v41 = vld [vmem:[%s859_s4 + $0x10] sm:$0xff]  ;;  %v242_v42 = vld [vmem:[%s859_s4 + $0x8] sm:$0xff] }
   0xe   :  { %567 = vmatprep.subr.mxu0 %v36_v7  ;;  %v241_v43 = vld [vmem:[%s859_s4] sm:$0xff] }
   0xf   :  { %568 = vmatpush3.msra.mxu0 %v36_v7  ;;  %v489_v44 = vld [vmem:[%s860_s3] ss:$0 sm:$0xff] }
  0x10   :  { %569 = vmatprep.subr.mxu0 %v35_v8  ;;  %v494_v62 = vld [vmem:[%s861_s5] ss:$0 sm:$0xff] }
  0x11   :  { %570 = vmatpush3.msra.mxu0 %v35_v8 }
  0x12   :  { %571 = vmatprep.subr.mxu0 %v34_v9 }
  0x13   :  { %572 = vmatpush3.msra.mxu0 %v34_v9 }
  0x14   :  { %573 = vmatprep.subr.mxu0 %v33_v10 }
  0x15   :  { %574 = vmatpush3.msra.mxu0 %v33_v10 }
  0x16   :  { %575 = vmatprep.subr.mxu0 %v32_v11 }
  0x17   :  { %576 = vmatpush3.msra.mxu0 %v32_v11 }
  0x18   :  { %577 = vmatprep.subr.mxu0 %v31_v12 }
  0x19   :  { %578 = vmatpush3.msra.mxu0 %v31_v12 }
  0x1a   :  { %579 = vmatprep.subr.mxu0 %v30_v13 }
  0x1b   :  { %580 = vmatpush3.msra.mxu0 %v30_v13 }
  0x1c   :  { %581 = vmatprep.subr.mxu0 %v29_v14 }
  0x1d   :  { %582 = vmatpush3.msra.mxu0 %v29_v14 }
  0x1e   :  { %583 = vmatprep.subr.mxu0 %v28_v15 }
  0x1f   :  { %584 = vmatpush3.msra.mxu0 %v28_v15 }
  0x20   :  { %585 = vmatprep.subr.mxu0 %v27_v16 }
  0x21   :  { %586 = vmatpush3.msra.mxu0 %v27_v16 }
  0x22   :  { %588 = vmatmul.mubr.f32.vlgmr.msra.gmra.mxu0 %v24_v17 }
  0x23   :  { %590 = vmatprep.mubr.f32.mxu0 %v25_v18 }
  0x26   :  { %591 = vmatmul.mubr.f32.gmra.mxu0 %v26_v19 }
  0x27   :  { %653 = vmatprep.mubr.msk.f32.mxu0 %vm139_vm0, %v128_v20 }
  0xe2   :  { %v589_v21 = vpop.f32.mrf.mxu0 }
  0xe4   :  { %v109_v22 = vpop.f32.mrf.mxu0 }
  0xe6   :  { %v592_v23 = vpop.f32.mrf.mxu0 }
  0xe7   :  { %593 = vmatprep.subr.mxu1 %v592_v23 }
  0xe8   :  { %v119_v24 = vpop.f32.mrf.mxu0  ;;  %594 = vmatpush3.msra.mxu1 %v592_v23 }
  0xe9   :  { %595 = vmatprep.subr.mxu1 %v119_v24 }
  0xea   :  { %596 = vmatpush3.msra.mxu1 %v119_v24 }
  0xeb   :  { %597 = vmatprep.subr.mxu1 %v589_v21 }
  0xec   :  { %598 = vmatpush3.msra.mxu1 %v589_v21 }
  0xed   :  { %599 = vmatprep.subr.mxu1 %v109_v22 }
  0xee   :  { %600 = vmatpush3.msra.mxu1 %v109_v22 }
  0xef   :  { %602 = vmatmul.mubr.msk.f32.vlgmr.msra.gmra.mxu1 %vm139_vm0, %v766_v25  ;;  %607 = vmatprep.subr.mxu1 %v256_v26 }
  0xf0   :  { %604 = vmatprep.mubr.msk.f32.mxu1 %vm139_vm0, %v774_v27  ;;  %608 = vmatpush3.msra.mxu1 %v256_v26 }
  0xf1   :  { %609 = vmatprep.subr.mxu1 %v255_v28 }
  0xf2   :  { %610 = vmatpush3.msra.mxu1 %v255_v28 }
  0xf3   :  { %605 = vmatmul.mubr.msk.f32.gmra.mxu1 %vm139_vm0, %v786_v29  ;;  %611 = vmatprep.subr.mxu1 %v254_v30 }
  0xf4   :  { %612 = vmatpush3.msra.mxu1 %v254_v30 }
  0xf5   :  { %613 = vmatprep.subr.mxu1 %v253_v31 }
  0xf6   :  { %614 = vmatpush3.msra.mxu1 %v253_v31 }
  0xf7   :  { %615 = vmatprep.subr.mxu1 %v252_v32 }
  0xf8   :  { %616 = vmatpush3.msra.mxu1 %v252_v32 }
  0xf9   :  { %617 = vmatprep.subr.mxu1 %v251_v33 }
  0xfa   :  { %618 = vmatpush3.msra.mxu1 %v251_v33 }
  0xfb   :  { %619 = vmatprep.subr.mxu1 %v250_v34 }
  0xfc   :  { %620 = vmatpush3.msra.mxu1 %v250_v34 }
  0xfd   :  { %621 = vmatprep.subr.mxu1 %v249_v35 }
  0xfe   :  { %622 = vmatpush3.msra.mxu1 %v249_v35 }
  0xff   :  { %623 = vmatprep.subr.mxu1 %v248_v36 }
 0x100   :  { %624 = vmatpush3.msra.mxu1 %v248_v36 }
 0x101   :  { %625 = vmatprep.subr.mxu1 %v247_v37 }
 0x102   :  { %626 = vmatpush3.msra.mxu1 %v247_v37 }
 0x103   :  { %627 = vmatprep.subr.mxu1 %v246_v38 }
 0x104   :  { %628 = vmatpush3.msra.mxu1 %v246_v38 }
 0x105   :  { %629 = vmatprep.subr.mxu1 %v245_v39 }
 0x106   :  { %630 = vmatpush3.msra.mxu1 %v245_v39 }
 0x107   :  { %631 = vmatprep.subr.mxu1 %v244_v40 }
 0x108   :  { %632 = vmatpush3.msra.mxu1 %v244_v40 }
 0x109   :  { %633 = vmatprep.subr.mxu1 %v243_v41 }
 0x10a   :  { %634 = vmatpush3.msra.mxu1 %v243_v41 }
 0x10b   :  { %635 = vmatprep.subr.mxu1 %v242_v42 }
 0x10c   :  { %636 = vmatpush3.msra.mxu1 %v242_v42 }
 0x10d   :  { %637 = vmatprep.subr.mxu1 %v241_v43 }
 0x10e   :  { %638 = vmatpush3.msra.mxu1 %v241_v43 }
 0x1af   :  { %v603_v45 = vpop.f32.mrf.mxu1 }
 0x1b0   :  { %v224_v46 = vadd.f32 %v603_v45, %v489_v44 }
 0x1b1   :  { %v218_v47 = vpop.f32.mrf.mxu1 }
 0x1b2   :  { %v219_v48 = vadd.f32 %v489_v44, %v218_v47  ;;  %v238_v51 = vmax.f32 %v224_v46, 0.0 }
 0x1b3   :  { %v606_v49 = vpop.f32.mrf.mxu1 }
 0x1b4   :  { %v237_v50 = vmax.f32 %v219_v48, 0.0  ;;  %v234_v52 = vadd.f32 %v606_v49, %v489_v44 }
 0x1b5   :  { %v228_v53 = vpop.f32.mrf.mxu1 }
 0x1b6   :  { %v229_v54 = vadd.f32 %v489_v44, %v228_v53  ;;  %639 = vmatprep.mubr.f32.mxu1 %v237_v50  ;;  %v240_v56 = vmax.f32 %v234_v52, 0.0 }
 0x1b7   :  { %640 = vmatmul.mubr.f32.vlgmr.msra.gmra.mxu1 %v238_v51 }
 0x1b8   :  { %v239_v55 = vmax.f32 %v229_v54, 0.0 }
 0x1ba   :  { %642 = vmatprep.mubr.f32.mxu1 %v239_v55 }
 0x1bb   :  { %643 = vmatmul.mubr.f32.gmra.mxu1 %v240_v56 }
 0x277   :  { %v641_v57 = vpop.f32.mrf.mxu1 }
 0x279   :  { %v323_v58 = vpop.f32.mrf.mxu1 }
 0x27b   :  { %v644_v59 = vpop.f32.mrf.mxu1 }
 0x27c   :  { %645 = vmatprep.subr.mxu0 %v644_v59 }
 0x27d   :  { %v333_v60 = vpop.f32.mrf.mxu1  ;;  %646 = vmatpush3.msra.mxu0 %v644_v59 }
 0x27e   :  { %647 = vmatprep.subr.mxu0 %v333_v60 }
 0x27f   :  { %648 = vmatpush3.msra.mxu0 %v333_v60 }
 0x280   :  { %649 = vmatprep.subr.mxu0 %v641_v57 }
 0x281   :  { %650 = vmatpush3.msra.mxu0 %v641_v57 }
 0x282   :  { %651 = vmatprep.subr.mxu0 %v323_v58 }
 0x283   :  { %652 = vmatpush3.msra.mxu0 %v323_v58 }
 0x284   :  { %654 = vmatmul.mubr.msk.f32.vlgmr.msra.gmra.mxu0 %vm139_vm0, %v766_v25 }
 0x285   :  { %656 = vmatprep.mubr.msk.f32.mxu0 %vm139_vm0, %v774_v27 }
 0x288   :  { %657 = vmatmul.mubr.msk.f32.gmra.mxu0 %vm139_vm0, %v786_v29 }
 0x344   :  { %v655_v61 = vpop.f32.mrf.mxu0 }
 0x345   :  { %v421_v0 = vadd.f32 %v655_v61, %v494_v62 }
 0x346   :  { %v415_v63 = vpop.f32.mrf.mxu0 }
 0x347   :  { %v416_v1 = vadd.f32 %v494_v62, %v415_v63 }
 0x348   :  { %v658_v2 = vpop.f32.mrf.mxu0 }
 0x349   :  { %v434_v3 = vadd.f32 %v421_v0, %v416_v1  ;;  %v431_v6 = vadd.f32 %v658_v2, %v494_v62 }
 0x34a   :  { %v425_v4 = vpop.f32.mrf.mxu0 }
 0x34b   :  { %v435_v5 = vrot.slane %v434_v3, 4  ;;  %v426_v7 = vadd.f32 %v494_v62, %v425_v4 }
 0x34d   :  { %v436_v8 = vadd.f32 %v435_v5, %v434_v3  ;;  %v458_v9 = vadd.f32 %v431_v6, %v426_v7 }
 0x34f   :  { %v437_v10 = vrot.slane %v436_v8, 2  ;;  %v459_v11 = vrot.slane %v458_v9, 4 }
 0x351   :  { %v438_v12 = vadd.f32 %v437_v10, %v436_v8  ;;  %v460_v13 = vadd.f32 %v459_v11, %v458_v9 }
 0x353   :  { %v439_v14 = vrot.slane %v438_v12, 1  ;;  %v461_v15 = vrot.slane %v460_v13, 2 }
 0x355   :  { %v440_v16 = vadd.f32 %v439_v14, %v438_v12  ;;  %v462_v17 = vadd.f32 %v461_v15, %v460_v13 }
 0x357   :  { %v442_v18 = vmul.f32 0.0625, %v440_v16  ;;  %v463_v19 = vrot.slane %v462_v17, 1 }
 0x359   :  { %v443_v20 = vsub.f32 %v416_v1, %v442_v18  ;;  %v444_v21 = vsub.f32 %v421_v0, %v442_v18  ;;  %v464_v22 = vadd.f32 %v463_v19, %v462_v17 }
 0x35b   :  { %v445_v23 = vmul.f32 %v443_v20, %v443_v20  ;;  %v446_v24 = vmul.f32 %v444_v21, %v444_v21  ;;  %v465_v25 = vmul.f32 0.0625, %v464_v22 }
 0x35d   :  { %v447_v26 = vadd.f32 %v446_v24, %v445_v23  ;;  %v466_v27 = vsub.f32 %v426_v7, %v465_v25  ;;  %v467_v28 = vsub.f32 %v431_v6, %v465_v25 }
 0x35f   :  { %v448_v29 = vrot.slane %v447_v26, 4  ;;  %v468_v30 = vmul.f32 %v466_v27, %v466_v27  ;;  %v469_v31 = vmul.f32 %v467_v28, %v467_v28 }
 0x361   :  { %v449_v32 = vadd.f32 %v448_v29, %v447_v26  ;;  %v470_v33 = vadd.f32 %v469_v31, %v468_v30 }
 0x363   :  { %v450_v34 = vrot.slane %v449_v32, 2  ;;  %v471_v35 = vrot.slane %v470_v33, 4 }
 0x365   :  { %v451_v36 = vadd.f32 %v450_v34, %v449_v32  ;;  %v472_v37 = vadd.f32 %v471_v35, %v470_v33 }
 0x367   :  { %v452_v38 = vrot.slane %v451_v36, 1  ;;  %v473_v39 = vrot.slane %v472_v37, 2 }
 0x369   :  { %v453_v40 = vadd.f32 %v452_v38, %v451_v36  ;;  %v474_v41 = vadd.f32 %v473_v39, %v472_v37 }
 0x36b   :  { %v454_v42 = vmul.f32 0.06666667, %v453_v40  ;;  %v475_v43 = vrot.slane %v474_v41, 1 }
 0x36d   :  { %659 = vrsqrt.f32 %v454_v42  ;;  %v476_v44 = vadd.f32 %v475_v43, %v474_v41 }
 0x36f   :  { %v477_v45 = vmul.f32 0.06666667, %v476_v44 }
 0x371   :  { %661 = vrsqrt.f32 %v477_v45 }
 0x37a   :  { %v660_v46 = vpop.eup %659 }
 0x37b   :  { %v456_v47 = vmul.f32 %v660_v46, %v443_v20  ;;  %v457_v48 = vmul.f32 %v660_v46, %v444_v21 }
 0x37d   :  { %481 = vst [vmem:[%s862_s6] sm:$0xff] %v456_v47  ;;  %482 = vst [vmem:[%s862_s6 + $0x8] sm:$0xff] %v457_v48 }
 0x37e   :  { %v662_v49 = vpop.eup %661 }
 0x37f   :  { %v479_v50 = vmul.f32 %v662_v49, %v466_v27  ;;  %v480_v51 = vmul.f32 %v662_v49, %v467_v28 }
 0x381   :  { %483 = vst [vmem:[%s862_s6 + $0x10] sm:$0xff] %v479_v50  ;;  %484 = vst [vmem:[%s862_s6 + $0x18] sm:$0xff] %v480_v51 }

</bundles_post_ra>
